<compile_context>
chip_gen: v5e
topology: v5e:2x2
jax: 0.10.0
libtpu: 0.0.40
codegen_flags: <defaults>
</compile_context>

<pallas_src>
import jax
import jax.numpy as jnp
from jax.experimental import pallas as pl
from jax.experimental.pallas import tpu as pltpu


def _round_up(n, m):
    return ((n + m - 1) // m) * m


def _mlp_kernel(x_ref, w_st_ref, b_st_ref, wb_ref, bb_ref, out_ref):
    """One edge tile. Edges on lanes, features/hidden on sublanes.

    x_ref:    (S_pad + T_pad, TE) bf16   stacked [xs; xt], streamed per tile
    w_st_ref: (2*H_pad, S_pad + T_pad) bf16  block-diag [[Ws, 0], [0, Wt]]
    b_st_ref: (2*H_pad, 1) f32               stacked [bs; bt]
    wb_ref:   (H_pad, H_pad) bf16             bilinear weight (out_features=1)
    bb_ref:   (1,) f32 in SMEM                bilinear bias scalar
    out_ref:  (1, TE) f32                     lane-dense logits
    """
    # Fused source+target branch: one MXU matmul, f32 accumulate.
    h = jnp.dot(w_st_ref[...], x_ref[...], preferred_element_type=jnp.float32)
    h = jnp.maximum(h + b_st_ref[...], 0.0)          # (2*H_pad, TE)

    h_pad = wb_ref.shape[0]
    hs = h[:h_pad, :]                                # (H_pad, TE)
    ht = h[h_pad:, :]                                # (H_pad, TE)

    # Bilinear(out_features=1): logits[e] = sum_i hs[i,e] * (Wb @ ht)[i,e] + b
    tmp = jnp.dot(wb_ref[...], ht.astype(jnp.bfloat16),
                  preferred_element_type=jnp.float32)           # (H_pad, TE)
    out_ref[...] = jnp.sum(hs * tmp, axis=0, keepdims=True) + bb_ref[0]


def mlp_forward(x_source, x_target, edge_label_index, params, *, tile_edges=8192):
    """Gathers endpoint features (glue), then runs the Pallas kernel over edge tiles."""
    src_ix = edge_label_index[0]
    tgt_ix = edge_label_index[1]
    E = src_ix.shape[0]
    S = x_source.shape[1]
    T = x_target.shape[1]
    H = params["w_source"].shape[0]          # torch Linear weight: (H, S)

    # Sublane-tile padding only for feature/hidden dims (bf16 packs 16 rows/vreg);
    # the edge axis (lanes) is padded to multiples of 128.
    S_pad = _round_up(S, 16)
    T_pad = _round_up(T, 16)
    H_pad = _round_up(H, 16)

    tile_edges = _round_up(max(tile_edges, 128), 128)     # defensive lane rounding
    # >= 2 balanced blocks when E allows it (megacore sharding on v7x), and no
    # gross over-padding of small E.
    TE = min(tile_edges, _round_up(pl.cdiv(max(E, 1), 2), 128))
    E_pad = _round_up(max(E, 1), TE)
    num_blocks = E_pad // TE

    bf16 = jnp.bfloat16

    # Cast node features to bf16 BEFORE the gather (halves gather traffic), then
    # gather, pad, stack source/target features and go feature-major.
    xs = x_source.astype(bf16)[src_ix]                    # (E, S)
    xt = x_target.astype(bf16)[tgt_ix]                    # (E, T)
    xs_p = jnp.pad(xs, ((0, E_pad - E), (0, S_pad - S)))
    xt_p = jnp.pad(xt, ((0, E_pad - E), (0, T_pad - T)))
    x_stack = jnp.concatenate([xs_p, xt_p], axis=1).T     # (S_pad+T_pad, E_pad)

    # Block-diagonal fused weight [[Ws, 0], [0, Wt]] and stacked bias [bs; bt].
    w_st = jnp.zeros((2 * H_pad, S_pad + T_pad), jnp.float32)
    w_st = w_st.at[:H, :S].set(params["w_source"].astype(jnp.float32))
    w_st = w_st.at[H_pad:H_pad + H, S_pad:S_pad + T].set(
        params["w_target"].astype(jnp.float32))
    w_st = w_st.astype(bf16)

    b_st = jnp.zeros((2 * H_pad, 1), jnp.float32)
    b_st = b_st.at[:H, 0].set(params["b_source"].astype(jnp.float32))
    b_st = b_st.at[H_pad:H_pad + H, 0].set(params["b_target"].astype(jnp.float32))

    wb = jnp.zeros((H_pad, H_pad), jnp.float32)
    wb = wb.at[:H, :H].set(params["w_bilinear"][0].astype(jnp.float32)).astype(bf16)
    bb = params["b_bilinear"].reshape(1).astype(jnp.float32)   # scalar -> SMEM

    # Resident (single-buffered) VMEM weights; SMEM scalar bias.
    vmem_full = pl.BlockSpec(memory_space=pltpu.MemorySpace.VMEM)
    smem_full = pl.BlockSpec(memory_space=pltpu.MemorySpace.SMEM)

    out = pl.pallas_call(
        _mlp_kernel,
        out_shape=jax.ShapeDtypeStruct((1, E_pad), jnp.float32),
        grid_spec=pltpu.PrefetchScalarGridSpec(
            num_scalar_prefetch=0,
            grid=(num_blocks,),
            in_specs=[
                pl.BlockSpec((S_pad + T_pad, TE), lambda i: (0, i)),  # streamed [xs;xt]
                vmem_full,                                            # W block-diag
                vmem_full,                                            # [bs; bt]
                vmem_full,                                            # Wb
                smem_full,                                            # bb scalar
            ],
            out_specs=pl.BlockSpec((1, TE), lambda i: (0, i)),        # lane-dense logits
        ),
        compiler_params=pltpu.CompilerParams(
            dimension_semantics=("parallel",),    # edge tiles shard across TCs (v7x)
        ),
    )(x_stack, w_st, b_st, wb, bb)

    return out[0, :E]                             # torch.squeeze(logits) -> (E,)


def init_params(key, source_size, target_size, hidden_size):
    """Deterministic synthetic parameters with the same shapes as the torch module."""
    k1, k2, k3, k4, k5, k6 = jax.random.split(key, 6)

    def unif(k, shape, fan_in):
        bound = 1.0 / jnp.sqrt(fan_in)
        return jax.random.uniform(k, shape, jnp.float32, -bound, bound)

    return {
        "w_source": unif(k1, (hidden_size, source_size), source_size),
        "b_source": unif(k2, (hidden_size,), source_size),
        "w_target": unif(k3, (hidden_size, target_size), target_size),
        "b_target": unif(k4, (hidden_size,), target_size),
        "w_bilinear": unif(k5, (1, hidden_size, hidden_size), hidden_size),
        "b_bilinear": unif(k6, (1,), hidden_size),
    }


if __name__ == "__main__":
    key = jax.random.PRNGKey(0)
    k_src, k_tgt, k_e0, k_e1, k_param = jax.random.split(key, 5)

    source_size, target_size, hidden_size = 16, 24, 32
    num_source_nodes, num_target_nodes, num_edges = 64, 48, 300

    x_source = jax.random.normal(k_src, (num_source_nodes, source_size), jnp.float32)
    x_target = jax.random.normal(k_tgt, (num_target_nodes, target_size), jnp.float32)
    edge_label_index = jnp.stack([
        jax.random.randint(k_e0, (num_edges,), 0, num_source_nodes),
        jax.random.randint(k_e1, (num_edges,), 0, num_target_nodes),
    ])

    params = init_params(k_param, source_size, target_size, hidden_size)

    # E=300 with the default tile_edges exercises the 2-block grid
    # (TE = round_up(ceil(300/2), 128) = 256) and the edge-padding path.
    logits = mlp_forward(x_source, x_target, edge_label_index, params)
    jax.block_until_ready(logits)

    # Reference using the same bf16 matmul operands / f32 accumulation as the kernel.
    bf16 = jnp.bfloat16
    xs = x_source[edge_label_index[0]]
    xt = x_target[edge_label_index[1]]
    hs = jax.nn.relu(
        jnp.dot(xs.astype(bf16), params["w_source"].astype(bf16).T,
                preferred_element_type=jnp.float32) + params["b_source"])
    ht = jax.nn.relu(
        jnp.dot(xt.astype(bf16), params["w_target"].astype(bf16).T,
                preferred_element_type=jnp.float32) + params["b_target"])
    tmp = jnp.dot(ht.astype(bf16), params["w_bilinear"][0].astype(bf16).T,
                  preferred_element_type=jnp.float32)
    ref = jnp.sum(hs * tmp, axis=-1) + params["b_bilinear"][0]

    assert logits.shape == (num_edges,)
    max_err = float(jnp.max(jnp.abs(logits - ref)))
    assert jnp.allclose(logits, ref, atol=2e-2, rtol=2e-2), max_err

    print("KERNEL_OK")
</pallas_src>

<mosaic_0001>
module attributes {stable_mosaic.version = 11 : i64} {
  func.func @_mlp_kernel(%arg0: i32, %arg1: memref<48x256xbf16, #tpu.memory_space<vmem>>, %arg2: memref<64x48xbf16, #tpu.memory_space<vmem>>, %arg3: memref<64x1xf32, #tpu.memory_space<vmem>>, %arg4: memref<32x32xbf16, #tpu.memory_space<vmem>>, %arg5: memref<1xf32, #tpu.memory_space<smem>>, %arg6: memref<1x256xf32, #tpu.memory_space<vmem>>) attributes {dimension_semantics = [#tpu.dimension_semantics<parallel>], iteration_bounds = array<i64: 2>, scalar_prefetch = 0 : i64, scratch_operands = 0 : i64, tpu.core_type = #tpu.core_type<tc>, window_params = [{transform_indices = @transform_0, window_bounds = array<i64: 48, 256>}, {pipeline_mode = #tpu.pipeline_mode<synchronous>, transform_indices = @transform_1, window_bounds = array<i64: 64, 48>}, {pipeline_mode = #tpu.pipeline_mode<synchronous>, transform_indices = @transform_2, window_bounds = array<i64: 64, 1>}, {pipeline_mode = #tpu.pipeline_mode<synchronous>, transform_indices = @transform_3, window_bounds = array<i64: 32, 32>}, {transform_indices = @transform_4, window_bounds = array<i64: 1>}, {transform_indices = @transform_5, window_bounds = array<i64: 1, 256>}]} {
    %c0 = arith.constant 0 : index
    %c0_0 = arith.constant 0 : index
    %0 = vector.load %arg2[%c0, %c0_0] : memref<64x48xbf16, #tpu.memory_space<vmem>>, vector<64x48xbf16>
    %c0_1 = arith.constant 0 : index
    %c0_2 = arith.constant 0 : index
    %1 = vector.load %arg1[%c0_1, %c0_2] : memref<48x256xbf16, #tpu.memory_space<vmem>>, vector<48x256xbf16>
    %cst = arith.constant dense<0.000000e+00> : vector<64x256xf32>
    %2 = tpu.matmul %0, %1, %cst {dimension_numbers = #tpu.dot_dimension_numbers<[1], [0], [0], [1], [0, 0, 1, 1], [], []>} : vector<64x48xbf16>, vector<48x256xbf16>, vector<64x256xf32> -> vector<64x256xf32>
    %c0_3 = arith.constant 0 : index
    %c0_4 = arith.constant 0 : index
    %3 = vector.load %arg3[%c0_3, %c0_4] : memref<64x1xf32, #tpu.memory_space<vmem>>, vector<64x1xf32>
    %4 = vector.broadcast %3 : vector<64x1xf32> to vector<64x256xf32>
    %5 = arith.addf %2, %4 : vector<64x256xf32>
    %cst_5 = arith.constant 0.000000e+00 : f32
    %6 = vector.broadcast %cst_5 : f32 to vector<64x256xf32>
    %7 = arith.maximumf %5, %6 : vector<64x256xf32>
    %8 = vector.extract_strided_slice %7 {offsets = [0, 0], sizes = [32, 256], strides = [1, 1]} : vector<64x256xf32> to vector<32x256xf32>
    %9 = vector.extract_strided_slice %7 {offsets = [32, 0], sizes = [32, 256], strides = [1, 1]} : vector<64x256xf32> to vector<32x256xf32>
    %c0_6 = arith.constant 0 : index
    %c0_7 = arith.constant 0 : index
    %10 = vector.load %arg4[%c0_6, %c0_7] : memref<32x32xbf16, #tpu.memory_space<vmem>>, vector<32x32xbf16>
    %11 = arith.truncf %9 : vector<32x256xf32> to vector<32x256xbf16>
    %cst_8 = arith.constant dense<0.000000e+00> : vector<32x256xf32>
    %12 = tpu.matmul %10, %11, %cst_8 {dimension_numbers = #tpu.dot_dimension_numbers<[1], [0], [0], [1], [0, 0, 1, 1], [], []>} : vector<32x32xbf16>, vector<32x256xbf16>, vector<32x256xf32> -> vector<32x256xf32>
    %13 = arith.mulf %8, %12 : vector<32x256xf32>
    %cst_9 = arith.constant dense<0.000000e+00> : vector<256xf32>
    %14 = vector.multi_reduction <add>, %13, %cst_9 [0] : vector<32x256xf32> to vector<256xf32>
    %15 = vector.shape_cast %14 : vector<256xf32> to vector<1x256xf32>
    %c0_10 = arith.constant 0 : index
    %16 = memref.load %arg5[%c0_10] : memref<1xf32, #tpu.memory_space<smem>>
    %17 = vector.broadcast %16 : f32 to vector<1x256xf32>
    %18 = arith.addf %15, %17 : vector<1x256xf32>
    %c0_11 = arith.constant 0 : index
    %c0_12 = arith.constant 0 : index
    %19 = vector.load %arg6[%c0_11, %c0_12] : memref<1x256xf32, #tpu.memory_space<vmem>>, vector<1x256xf32>
    tpu.vector_store %arg6[%c0_11, %c0_12], %18 {strides = array<i32>} : memref<1x256xf32, #tpu.memory_space<vmem>>, vector<1x256xf32>,
    return
  }
  func.func @transform_0(%arg0: i32) -> (i32, i32) {
    %c0_i32 = arith.constant 0 : i32
    %c0_i32_0 = arith.constant 0 : i32
    return %c0_i32, %arg0 : i32, i32
  }
  func.func @transform_1(%arg0: i32) -> (i32, i32) {
    %c0_i32 = arith.constant 0 : i32
    %c0_i32_0 = arith.constant 0 : i32
    %c0_i32_1 = arith.constant 0 : i32
    return %c0_i32, %c0_i32_0 : i32, i32
  }
  func.func @transform_2(%arg0: i32) -> (i32, i32) {
    %c0_i32 = arith.constant 0 : i32
    %c0_i32_0 = arith.constant 0 : i32
    %c0_i32_1 = arith.constant 0 : i32
    return %c0_i32, %c0_i32_0 : i32, i32
  }
  func.func @transform_3(%arg0: i32) -> (i32, i32) {
    %c0_i32 = arith.constant 0 : i32
    %c0_i32_0 = arith.constant 0 : i32
    %c0_i32_1 = arith.constant 0 : i32
    return %c0_i32, %c0_i32_0 : i32, i32
  }
  func.func @transform_4(%arg0: i32) -> i32 {
    %c0_i32 = arith.constant 0 : i32
    %c0_i32_0 = arith.constant 0 : i32
    return %c0_i32 : i32
  }
  func.func @transform_5(%arg0: i32) -> (i32, i32) {
    %c0_i32 = arith.constant 0 : i32
    %c0_i32_0 = arith.constant 0 : i32
    return %c0_i32, %arg0 : i32, i32
  }
}

</mosaic_0001>

<bundles_post_ra>
// kernel: tpu_custom_call.1
= control target key start
LH: loop header
LB: loop body
LE: loop exit
PB: predicated region body
PF: predicated region fallthrough
CT: control target
= control target key end

     0   :  { %s1045_s0 = inlined_call_operand.vmem [shape: bf16[48,512], index: 0, kind: input, shape index: {}]   ;;  %s1046_s1 = inlined_call_operand.vmem [shape: bf16[64,48], index: 1, kind: input, shape index: {}]   ;;  %s1047_s2 = inlined_call_operand.vmem [shape: f32[64,1], index: 2, kind: input, shape index: {}]   ;;  %s1048_s3 = inlined_call_operand.vmem [shape: bf16[32,32], index: 3, kind: input, shape index: {}]   ;;  %s1049_s4 = inlined_call_operand.<no memory space> [shape: f32[1], index: 4, kind: input, shape index: {}]   ;;  %s1050_s5 = inlined_call_operand.hbm [shape: f32[1,512], index: 5, kind: output, shape index: {}]  }
   0x1   :  { %10 = sst [smem:[#allocation2]] %s1049_s4 }
   0x2   :  { %11 = vsyncpa [#allocation5], 0 }
   0x3   :  { %13 = vsyncpa [#allocation5 + $0x1], 0  ;;  %s900_s20 = smov 0   ;;  %s902_s21 = smov 0  }
   0x4   :  { %s904_s22 = smov 0   ;;  %s906_s23 = smov 0  }
   0x5 LB: > { %s666_s4 = sadd.s32 4294967295, %s864_s23   ;;  %s667_s24 = sadd.s32 4294967294, %s864_s23   ;;  %s864_s23 = sphi %s906_s23, %s1056_s23   ;;  %s860_s22 = sphi %s904_s22, %s1055_s22   ;;  %s856_s21 = sphi %s902_s21, %s1054_s21   ;;  %s852_s20 = sphi %s900_s20, %s1053_s20  }
   0x6   : > { %s923_s25 = sadd.s32 1, %s864_s23   ;;  %s26_s26 = sadd.s32 1, %s860_s22 }
   0x7   : > { %s23_s27 = ssub.s32 %s864_s23, %s923_s25  ;;  %p33_p0 = scmp.ne.s32.totalorder %s860_s22, %s856_s21 }
   0x8   : > { %p24_p1 = scmp.eq.s32.totalorder %s23_s27, 0  ;;  %p34_p2 = scmp.eq.s32.totalorder %s864_s23, 0 }
   0x9   : > { %p147_p3 = scmp.eq.s32.totalorder %s666_s4, 1  ;;  %p152_p4 = scmp.ne.s32.totalorder %s856_s21, %s852_s20 }
   0xa   : > { %s936_s28 = scalar_select %p24_p1, %s860_s22, %s26_s26  }
   0xb   : > { %p35_p5 = por %p34_p2, %p33_p0  ;;  %p938_p6 = por %p147_p3, %p33_p0 }
   0xc   : > { %p153_p7 = scmp.eq.s32.totalorder %s667_s24, 1  ;;  %p669_p9 = scmp.ge.s32.totalorder %s864_s23, 2 }
   0xe   : > { %p942_p8 = por %p153_p7, %p152_p4  ;;  %181 = sbr.rel (%p669_p9) target bundleno = 29 (0x1d), region = 32 }
  0x13   : > { %184 = sbr.rel (!%p35_p5) target bundleno = 29 (0x1d), region = 36  ;;  %s186_s6 = sand.u32 (%p35_p5), 1, %s860_s22  }
  0x14   : > { %s738_s7 = sshll.u32 (%p35_p5), %s864_s23, 3  ;;  %s757_s8 = smul.u32 (%p35_p5), 48, %s186_s6 }
  0x15   : > { %s191_s11 = scalar_lea.vmem (%p35_p5), %s1045_s0, %s738_s7 }
  0x16   : > { %v230_v0 = vld [vmem:[%s191_s11] sm:$0xff] (%p35_p5)  ;;  %v232_v1 = vld [vmem:[%s191_s11 + $0x10] sm:$0xff] (%p35_p5)  ;;  %s188_s12 = scalar_lea.vmem (%p35_p5), [#allocation3], %s757_s8 }
  0x17   : > { %v234_v2 = vld [vmem:[%s191_s11 + $0x20] sm:$0xff] (%p35_p5)  ;;  %231 = vst [vmem:[%s188_s12] sm:$0xff] (%p35_p5), %v230_v0  ;;  %v236_v3 = vld [vmem:[%s191_s11 + $0x30] sm:$0xff] (%p35_p5) }
  0x18   : > { %233 = vst [vmem:[%s188_s12 + $0x8] sm:$0xff] %v232_v1  ;;  %v238_v4 = vld [vmem:[%s191_s11 + $0x40] sm:$0xff]  ;;  %v240_v5 = vld [vmem:[%s191_s11 + $0x50] sm:$0xff] }
  0x19   : > { %235 = vst [vmem:[%s188_s12 + $0x10] sm:$0xff] %v234_v2 }
  0x1a   : > { %237 = vst [vmem:[%s188_s12 + $0x18] sm:$0xff] %v236_v3 }
  0x1b   : > { %239 = vst [vmem:[%s188_s12 + $0x20] sm:$0xff] %v238_v4 }
  0x1c   : > { %241 = vst [vmem:[%s188_s12 + $0x28] sm:$0xff] %v240_v5 }
  0x1d PF: > { %p672_p10 = scmp.ge.s32.totalorder %s864_s23, 1  ;;  %p246_p11 = scmp.lt.s32.totalorder %s864_s23, 3 }
  0x1f   : > { %p247_p12 = pnand %p672_p10, %p246_p11 }
  0x20   : > { %s957_s13 = sand.u32 (!%p247_p12), 1, %s856_s21   ;;  %s571_s11 = sld [smem:[#allocation2]] (!%p247_p12) }
  0x21   : > { %250 = sbr.rel (%p247_p12) target bundleno = 409 (0x199), region = 74  ;;  %s673_s12 = sshll.u32 (!%p247_p12), %s957_s13, 1 }
  0x22   : > { %s758_s16 = smul.u32 (!%p247_p12), 48, %s957_s13  ;;  %s735_s14 = sshll.u32 (!%p247_p12), %s666_s4, 1 }
  0x23   : > { %s597_s17 = scalar_lea.hbm (!%p247_p12), %s1050_s5, %s735_s14  ;;  %s279_s18 = scalar_lea.vmem (!%p247_p12), [#allocation4], %s673_s12 }
  0x24   : > { %s255_s19 = scalar_lea.vmem (!%p247_p12), [#allocation3], %s758_s16  ;;  %s601_s24 = sshll.u32 (!%p247_p12), %s597_s17, 4  ;;  %s602_s24 = int_to_ptr.hbm [resolvable:$true] %s601_s24 }
  0x25   : > { %s587_s4 = scalar_lea.sflag (!%p247_p12), [#allocation5], %s957_s13  ;;  %s816_s26 = sshra.s32 (!%p247_p12), %s602_s24, 4  ;;  %s817_s26 = int_to_ptr.hbm [resolvable:$true] %s816_s26 }
  0x26   : > { %v303_v6 = vld [vmem:[%s1047_s2 + $0x30] sm:$0xff]  ;;  %v866_v7 = vmov 0   ;;  %v301_v8 = vld [vmem:[%s1047_s2 + $0x20] sm:$0xff]  ;;  %v748_v10 = vld [vmem:[%s255_s19 + $0x24] sm:$0xf0]  ;;  %vm395_vm0 = vcmask 392192   ;;  %p823_p2 = scmp.lt.s32.totalorder %s817_s26, %s1050_s5 }
  0x27   : > { %799 = vset.pattern.permute.xlu0 %v866_v7  ;;  %800 = vset.pattern.permute.xlu1 %v866_v7  ;;  %v708_v9 = vld [vmem:[%s255_s19 + $0x20] sm:$0xf]  ;;  %v747_v11 = vld [vmem:[%s255_s19 + $0x24] sm:$0xf]  ;;  %v710_v13 = vld [vmem:[%s255_s19 + $0x28] sm:$0xf0] }
  0x28   : > { %337 = vperm.xlu0 %799, %v303_v6   ;;  %801 = vset.pattern.permute.xlu2 %v866_v7  ;;  %v709_v12 = vor.u32 %v748_v10, %v708_v9  ;;  %v700_v14 = vld [vmem:[%s255_s19 + $0x10] sm:$0xf]  ;;  %v746_v15 = vld [vmem:[%s255_s19 + $0x14] sm:$0xf0]  ;;  %v713_v16 = vor.u32 %v747_v11, %v710_v13  ;;  %v745_v17 = vld [vmem:[%s255_s19 + $0x14] sm:$0xf] }
  0x29   : > { %327 = vperm.xlu1 %800, %v301_v8   ;;  %v702_v18 = vld [vmem:[%s255_s19 + $0x18] sm:$0xf0]  ;;  %v701_v19 = vor.u32 %v746_v15, %v700_v14  ;;  %v692_v22 = vld [vmem:[%s255_s19] sm:$0xf]  ;;  %v744_v23 = vld [vmem:[%s255_s19 + $0x4] sm:$0xf0] }
  0x2a   : > { %413 = vmatpush.bf16.msra.mxu0 %v709_v12  ;;  %751 = vmatpush.bf16.msra.mxu2 %v709_v12  ;;  %v304_v20 = vld [vmem:[%s1047_s2 + $0x38] sm:$0xff]  ;;  %v705_v21 = vor.u32 %v745_v17, %v702_v18  ;;  %v743_v24 = vld [vmem:[%s255_s19 + $0x4] sm:$0xf]  ;;  %v302_v26 = vld [vmem:[%s1047_s2 + $0x28] sm:$0xff]  ;;  %v693_v27 = vor.u32 %v744_v23, %v692_v22  ;;  %vm500_vm1 = vcmask 261120   ;;  %vm578_vm2 = vcmask 1040384  }
  0x2b   : > { %442 = vmatpush.bf16.msra.mxu1 %v713_v16  ;;  %754 = vmatpush.bf16.msra.mxu3 %v713_v16  ;;  %v694_v25 = vld [vmem:[%s255_s19 + $0x8] sm:$0xf0]  ;;  %v739_v29 = vld [vmem:[%s1046_s1] sm:$0xff]  ;;  %v299_v31 = vld [vmem:[%s1047_s2 + $0x10] sm:$0xff]  ;;  %s599_s19 = sshll.u32 %s279_s18, 4  ;;  %s818_s27 = scalar_lea.hbm %s817_s26, 2  ;;  %s600_s19 = int_to_ptr.vmem [resolvable:$true] %s599_s19 }
  0x2c   : > { %v697_v28 = vor.u32 %v743_v24, %v694_v25  ;;  %v742_v30 = vld [vmem:[%s1046_s1 + $0x18] sm:$0xff]  ;;  %v297_v33 = vld [vmem:[%s1047_s2] sm:$0xff]  ;;  %v298_v34 = vld [vmem:[%s1047_s2 + $0x8] sm:$0xff]  ;;  %p819_p13 = scmp.ne.s32.totalorder %s817_s26, %s818_s27  ;;  %s822_s8 = scalar_lea.hbm %s1050_s5, 4 }
  0x2d   : > { %v300_v32 = vld [vmem:[%s1047_s2 + $0x18] sm:$0xff]  ;;  %307 = vperm.xlu2 %801, %v297_v33   ;;  %v740_v35 = vld [vmem:[%s1046_s1 + $0x8] sm:$0xff]  ;;  %v741_v36 = vld [vmem:[%s1046_s1 + $0x10] sm:$0xff]  ;;  %p824_p3 = scmp.lt.s32.totalorder %s822_s8, %s818_s27 }
  0x2e   : > { %414 = vmatpush.bf16.msra.mxu0 %v701_v19  ;;  %752 = vmatpush.bf16.msra.mxu2 %v701_v19  ;;  %v749_v13 = vld [vmem:[%s1048_s3] sm:$0xff]  ;;  %v750_v14 = vld [vmem:[%s1048_s3 + $0x8] sm:$0xff]  ;;  %p820_p0 = pnand %p819_p13, %p938_p6 }
  0x2f   : > { %443 = vmatpush.bf16.msra.mxu1 %v705_v21  ;;  %755 = vmatpush.bf16.msra.mxu3 %v705_v21  ;;  %p825_p4 = por %p824_p3, %p823_p2 }
  0x30   : > { %342 = vperm.xlu0 %799, %v304_v20   ;;  %p821_p1 = pneg %p820_p0 }
  0x31   : > { %332 = vperm.xlu1 %800, %v302_v26  }
  0x32   : > { %415 = vmatpush.bf16.msra.mxu0 %v693_v27  ;;  %753 = vmatpush.bf16.msra.mxu2 %v693_v27  ;;  %p826_p5 = pnand %p825_p4, %p821_p1 }
  0x33   : > { %444 = vmatpush.bf16.msra.mxu1 %v697_v28  ;;  %756 = vmatpush.bf16.msra.mxu3 %v697_v28 }
  0x35   : > { %714 = vmatmul.msk.bf16.vlgmr.msra.gmra.mxu0 %vm395_vm0, %v739_v29  ;;  %717 = vmatmul.msk.bf16.vlgmr.msra.gmra.mxu2 %vm395_vm0, %v742_v30 }
  0x36   : > { %718 = vmatmul.msk.bf16.vlgmr.msra.gmra.mxu1 %vm395_vm0, %v739_v29  ;;  %721 = vmatmul.msk.bf16.vlgmr.msra.gmra.mxu3 %vm395_vm0, %v742_v30 }
  0x37   : > { %312 = vperm.xlu2 %801, %v298_v34  }
  0x38   : > { %317 = vperm.xlu0 %799, %v299_v31  }
  0x39   : > { %322 = vperm.xlu1 %800, %v300_v32  }
  0x45   : > { %715 = vmatmul.msk.bf16.gmra.mxu0 %vm395_vm0, %v740_v35 }
  0x46   : > { %719 = vmatmul.msk.bf16.gmra.mxu1 %vm395_vm0, %v740_v35 }
  0x55   : > { %716 = vmatmul.msk.bf16.gmra.mxu0 %vm395_vm0, %v741_v36 }
  0x56   : > { %720 = vmatmul.msk.bf16.gmra.mxu1 %vm395_vm0, %v741_v36 }
  0x87   : > { %v308_v15 = vpop.permute.xlu2 %307 }
  0x91   : > { %v313_v16 = vpop.permute.xlu2 %312 }
  0x9a   : > { %v338_v39 = vpop.permute.xlu0 %337 }
  0x9b   : > { %v328_v61 = vpop.permute.xlu1 %327 }
  0xa2   : > { %v343_v46 = vpop.permute.xlu0 %342 }
  0xa3   : > { %v333_v1 = vpop.permute.xlu1 %332 }
  0xaa   : > { %v318_v28 = vpop.permute.xlu0 %317 }
  0xb2   : > { %v417_v37 = vpop.f32.mrf.mxu0 }
  0xb3   : > { %v446_v38 = vpop.f32.mrf.mxu1  ;;  %v418_v19 = vadd.f32 %v417_v37, %v308_v15 }
  0xb4   : > { %v447_v21 = vadd.f32 %v446_v38, %v308_v15 }
  0xb5   : > { %v466_v23 = vmax.f32 %v418_v19, 0.0 }
  0xb6   : > { %v467_v25 = vmax.f32 %v447_v21, 0.0 }
  0xb8   : > { %v432_v40 = vpop.f32.mrf.mxu2 }
  0xb9   : > { %v461_v41 = vpop.f32.mrf.mxu3  ;;  %v433_v44 = vadd.f32 %v432_v40, %v338_v39 }
  0xba   : > { %v419_v42 = vpop.f32.mrf.mxu0  ;;  %v462_v45 = vadd.f32 %v461_v41, %v338_v39  ;;  %v323_v41 = vpop.permute.xlu1 %322 }
  0xbb   : > { %v448_v43 = vpop.f32.mrf.mxu1  ;;  %v478_v48 = vmax.f32 %v433_v44, 0.0  ;;  %v420_v20 = vadd.f32 %v419_v42, %v313_v16 }
  0xbc   : > { %v479_v52 = vmax.f32 %v462_v45, 0.0  ;;  %v449_v22 = vadd.f32 %v448_v43, %v313_v16 }
  0xbd   : > { %v468_v24 = vmax.f32 %v420_v20, 0.0 }
  0xbe   : > { %v469_v26 = vmax.f32 %v449_v22, 0.0 }
  0xc0   : > { %v434_v47 = vpop.f32.mrf.mxu2 }
  0xc1   : > { %v435_v49 = vadd.f32 %v434_v47, %v343_v46  ;;  %v463_v50 = vpop.f32.mrf.mxu3 }
  0xc2   : > { %v422_v51 = vpop.f32.mrf.mxu0  ;;  %v464_v53 = vadd.f32 %v463_v50, %v343_v46 }
  0xc3   : > { %v451_v54 = vpop.f32.mrf.mxu1  ;;  %v480_v55 = vmax.f32 %v435_v49, 0.0  ;;  %v423_v34 = vadd.f32 %v422_v51, %v318_v28 }
  0xc4   : > { %v481_v56 = vmax.f32 %v464_v53, 0.0  ;;  %v452_v36 = vadd.f32 %v451_v54, %v318_v28 }
  0xc5   : > { %v488_v57 = vpack.c.bf16 %v480_v55, %v478_v48  ;;  %v470_v40 = vmax.f32 %v423_v34, 0.0 }
  0xc6   : > { %v489_v58 = vpack.c.bf16 %v481_v56, %v479_v52  ;;  %v471_v37 = vmax.f32 %v452_v36, 0.0 }
  0xc7   : > { %513 = vmatpush.bf16.msrb.mxu2 %v488_v57 }
  0xc8   : > { %532 = vmatpush.bf16.msrb.mxu3 %v489_v58 }
  0xca   : > { %v424_v59 = vpop.f32.mrf.mxu0 }
  0xcb   : > { %v453_v60 = vpop.f32.mrf.mxu1  ;;  %v425_v45 = vadd.f32 %v424_v59, %v323_v41 }
  0xcc   : > { %v454_v47 = vadd.f32 %v453_v60, %v323_v41 }
  0xcd   : > { %v472_v49 = vmax.f32 %v425_v45, 0.0 }
  0xce   : > { %v473_v50 = vmax.f32 %v454_v47, 0.0 }
  0xd2   : > { %v427_v62 = vpop.f32.mrf.mxu0 }
  0xd3   : > { %v456_v63 = vpop.f32.mrf.mxu1  ;;  %v428_v0 = vadd.f32 %v427_v62, %v328_v61 }
  0xd4   : > { %v457_v2 = vadd.f32 %v456_v63, %v328_v61 }
  0xd5   : > { %v474_v7 = vmax.f32 %v428_v0, 0.0 }
  0xd6   : > { %v475_v9 = vmax.f32 %v457_v2, 0.0 }
  0xda   : > { %v429_v3 = vpop.f32.mrf.mxu0 }
  0xdb   : > { %v430_v4 = vadd.f32 %v429_v3, %v333_v1  ;;  %v458_v5 = vpop.f32.mrf.mxu1  ;;  %v572_v3 = vstv %s571_s11 }
  0xdc   : > { %v459_v6 = vadd.f32 %v458_v5, %v333_v1 }
  0xdd   : > { %v476_v8 = vmax.f32 %v430_v4, 0.0 }
  0xde   : > { %v477_v10 = vmax.f32 %v459_v6, 0.0  ;;  %v581_v6 = vlaneseq }
  0xdf   : > { %v486_v11 = vpack.c.bf16 %v476_v8, %v474_v7 }
  0xe0   : > { %v487_v12 = vpack.c.bf16 %v477_v10, %v475_v9  ;;  %vm583_vm3 = vcmp.lt.s32.totalorder %v581_v6, 256 }
  0xe1   : > { %514 = vmatpush.bf16.msrb.mxu2 %v486_v11 }
  0xe2   : > { %533 = vmatpush.bf16.msrb.mxu3 %v487_v12 }
  0xe4   : > { %730 = vmatmul.msk.bf16.vlgmr.msrb.gmra.mxu2 %vm500_vm1, %v749_v13 }
  0xe5   : > { %732 = vmatmul.msk.bf16.vlgmr.msrb.gmra.mxu3 %vm500_vm1, %v749_v13 }
  0xf4   : > { %731 = vmatmul.msk.bf16.gmra.mxu2 %vm500_vm1, %v750_v14 }
  0xf5   : > { %733 = vmatmul.msk.bf16.gmra.mxu3 %vm500_vm1, %v750_v14 }
 0x167   : > { %v516_v17 = vpop.f32.mrf.mxu2 }
 0x168   : > { %v535_v18 = vpop.f32.mrf.mxu3  ;;  %v545_v29 = vmul.f32 %v516_v17, %v466_v23 }
 0x169   : > { %v546_v32 = vmul.f32 %v535_v18, %v467_v25 }
 0x16f   : > { %v518_v27 = vpop.f32.mrf.mxu2 }
 0x170   : > { %v547_v30 = vmul.f32 %v518_v27, %v468_v24  ;;  %v537_v31 = vpop.f32.mrf.mxu3 }
 0x171   : > { %v548_v33 = vmul.f32 %v537_v31, %v469_v26 }
 0x172   : > { %v553_v35 = vadd.f32 %v547_v30, %v545_v29 }
 0x173   : > { %v562_v39 = vadd.f32 %v548_v33, %v546_v32 }
 0x177   : > { %v521_v38 = vpop.f32.mrf.mxu2 }
 0x178   : > { %v549_v42 = vmul.f32 %v521_v38, %v470_v40  ;;  %v540_v43 = vpop.f32.mrf.mxu3 }
 0x179   : > { %v550_v44 = vmul.f32 %v540_v43, %v471_v37 }
 0x17a   : > { %v554_v46 = vadd.f32 %v553_v35, %v549_v42 }
 0x17b   : > { %v563_v48 = vadd.f32 %v562_v39, %v550_v44 }
 0x17f   : > { %v523_v52 = vpop.f32.mrf.mxu2 }
 0x180   : > { %v551_v51 = vmul.f32 %v523_v52, %v472_v49  ;;  %v542_v53 = vpop.f32.mrf.mxu3 }
 0x181   : > { %v552_v54 = vmul.f32 %v542_v53, %v473_v50 }
 0x182   : > { %v555_v55 = vadd.f32 %v554_v46, %v551_v51 }
 0x183   : > { %v564_v56 = vadd.f32 %v563_v48, %v552_v54 }
 0x184   : > { %v556_v57 = vrot.slane %v555_v55, 4 }
 0x185   : > { %v565_v58 = vrot.slane %v564_v56, 4 }
 0x186   : > { %v557_v61 = vadd.f32 %v556_v57, %v555_v55 }
 0x187   : > { %v566_v62 = vadd.f32 %v565_v58, %v564_v56 }
 0x188   : > { %v558_v63 = vrot.slane %v557_v61, 2 }
 0x189   : > { %v567_v59 = vrot.slane %v566_v62, 2 }
 0x18a   : > { %v559_v0 = vadd.f32 %v558_v63, %v557_v61 }
 0x18b   : > { %v568_v60 = vadd.f32 %v567_v59, %v566_v62 }
 0x18c   : > { %v560_v1 = vrot.slane %v559_v0, 1 }
 0x18d   : > { %v569_v2 = vrot.slane %v568_v60, 1 }
 0x18e   : > { %v561_v4 = vadd.f32 %v560_v1, %v559_v0 }
 0x18f   : > { %v570_v5 = vadd.f32 %v569_v2, %v568_v60 }
 0x190   : > { %v573_v8 = vadd.f32 %v572_v3, %v561_v4 }
 0x191   : > { %v574_v7 = vadd.f32 %v572_v3, %v570_v5 }
 0x193   : > { %v577_v9 = vrot.slane %v574_v7, 7 }
 0x195   : > { %v579_v10 = vsel %vm578_vm2, %v573_v8, %v577_v9 }
 0x196   : > { %585 = vst.msk [vmem:[%s279_s18] sm:$0x3] %vm583_vm3, %v579_v10 }
 0x197   : > { %829 = shalt.err (!%p826_p5)
}
 0x198   : > { %759 = dma.vmem_to_hbm [thread:$0]  (%p938_p6), %s600_s19, 32, %s602_s24, %s587_s4  }
 0x199 PF: > { %s613_s13 = sand.u32 1, %s852_s20   ;;  %p762_p7 = pnand %p669_p9, %p942_p8 }
 0x19a   : > { %s614_s11 = scalar_lea.sflag [#allocation5], %s613_s13 }
 0x19b   : > { %p763_p10 = pneg %p762_p7 }
 0x19d   : > { %847 = dma.done.wait (%p763_p10), %s614_s11, 32  }
 0x19e   : > { %849 = vsyncadd (%p763_p10), %s614_s11, 4294967264  ;;  %p16_p11 = scmp.ge.s32.totalorder %s923_s25, 4   ;;  %s1053_s20 = smov %s856_s21 }
 0x19f   : > { %s1054_s21 = smov %s860_s22  ;;  %s1055_s22 = smov %s936_s28 }
 0x1a0   : > { %s1056_s23 = smov %s923_s25  ;;  %18 = sbr.rel (!%p16_p11) target bundleno = 5 (0x5), region = 118 }
 0x1a5   :  { %620 = vsyncpa [#allocation5], 1 }
 0x1a6   :  { %622 = vsyncpa [#allocation5 + $0x1], 1 }

</bundles_post_ra>
